<compile_context>
chip_gen: v7x
topology: tpu7x:2x2x1
jax: 0.10.0
libtpu: 0.0.40
codegen_flags: <defaults>
</compile_context>

<pallas_src>
import jax
import jax.numpy as jnp
import numpy as np
from jax.experimental import pallas as pl
from jax.experimental.pallas import tpu as pltpu


def _attn_classify_kernel(sim_ref, y_ref, out_ref):
    # sim_ref: (TB, K)   similarities tile
    # y_ref  : (K, TB, C) stacked one-hot labels tile (leading K = reduction axis)
    # out_ref: (TB, C)
    s = sim_ref[...].astype(jnp.float32)                   # (TB, K)
    m = jnp.max(s, axis=1, keepdims=True)                  # (TB, 1)
    e = jnp.exp(s - m)                                     # (TB, K)
    a = e / jnp.sum(e, axis=1, keepdims=True)              # softmax over K

    k_total = y_ref.shape[0]
    # Unrolled accumulate over the leading K axis: out += a[:, k] * y[k]
    acc = a[:, 0:1] * y_ref[0].astype(jnp.float32)          # (TB, C)
    for k in range(1, k_total):
        acc = acc + a[:, k:k + 1] * y_ref[k].astype(jnp.float32)
    out_ref[...] = acc.astype(out_ref.dtype)


def attentional_classify(similarities, support_set_y,
                         *, vmem_budget_bytes=16 * 1024 * 1024):
    """similarities: list of K arrays (B, 1); support_set_y: list of K arrays (B, C)."""
    sim = jnp.stack(similarities)          # (K, B, 1)
    y = jnp.stack(support_set_y)           # (K, B, C)  -- kept untransposed
    K, B, _ = sim.shape
    C = y.shape[-1]
    out_dtype = jnp.result_type(sim.dtype, y.dtype)

    # Only the tiny similarity tensor is transposed on the host (K*B elements).
    sim_bk = jnp.transpose(sim[..., 0], (1, 0)).astype(jnp.float32)   # (B, K)

    # Pick the B tile: the double-buffered y block dominates VMEM usage.
    itemsize = jnp.dtype(y.dtype).itemsize
    bytes_per_row = 2 * K * C * itemsize                    # x2: double buffering
    tb_cap = max(8, (vmem_budget_bytes // max(bytes_per_row, 1)) // 8 * 8)
    tb = B if B <= tb_cap else tb_cap                       # tb_cap is a multiple of 8
    grid = (pl.cdiv(B, tb),)

    out = pl.pallas_call(
        _attn_classify_kernel,
        out_shape=jax.ShapeDtypeStruct((B, C), out_dtype),
        grid=grid,
        in_specs=[
            pl.BlockSpec((tb, K), lambda i: (i, 0)),        # similarities (B, K)
            pl.BlockSpec((K, tb, C), lambda i: (0, i, 0)),  # labels (K, B, C), no transpose
        ],
        out_specs=pl.BlockSpec((tb, C), lambda i: (i, 0)),
        compiler_params=pltpu.CompilerParams(
            dimension_semantics=("parallel",),              # shard B tiles across TCs (v7x)
            vmem_limit_bytes=48 * 1024 * 1024,              # safe on v7x's 64 MiB VMEM
        ),
    )(sim_bk, y)
    return out


def _reference(similarities, support_set_y):
    """Pure-JAX mirror of the PyTorch forward for verification."""
    y = jnp.transpose(jnp.stack(support_set_y), (1, 0, 2))        # (B, K, C)
    sim = jnp.stack(similarities)                                 # (K, B, 1)
    soft = jax.nn.softmax(sim, axis=0)                            # softmax over dim 0 (K)
    soft = jnp.transpose(soft, (1, 0, 2))                         # (B, K, 1)
    preds = jnp.sum(soft * y, axis=1, keepdims=True)              # (B, 1, C)
    return jnp.squeeze(preds, axis=1)                             # (B, C)


if __name__ == "__main__":
    B, K, C = 8, 8, 16
    key = jax.random.PRNGKey(0)
    keys = jax.random.split(key, 2 * K)

    # similarities: list of K tensors of shape (B, 1)
    similarities = [jax.random.normal(keys[k], (B, 1), dtype=jnp.float32)
                    for k in range(K)]
    # support_set_y: list of K one-hot label tensors of shape (B, C)
    support_set_y = []
    for k in range(K):
        labels = jax.random.randint(keys[K + k], (B,), 0, C)
        support_set_y.append(jax.nn.one_hot(labels, C, dtype=jnp.float32))

    preds = attentional_classify(similarities, support_set_y)
    preds = jax.block_until_ready(preds)

    ref = _reference(similarities, support_set_y)
    np.testing.assert_allclose(np.asarray(preds), np.asarray(ref),
                               rtol=1e-5, atol=1e-5)
    print("KERNEL_OK")
</pallas_src>

<mosaic_0001>
module attributes {stable_mosaic.version = 11 : i64} {
  func.func @_attn_classify_kernel(%arg0: i32, %arg1: memref<8x8xf32, #tpu.memory_space<vmem>>, %arg2: memref<8x8x16xf32, #tpu.memory_space<vmem>>, %arg3: memref<8x16xf32, #tpu.memory_space<vmem>>) attributes {dimension_semantics = [#tpu.dimension_semantics<parallel>], iteration_bounds = array<i64: 1>, scalar_prefetch = 0 : i64, scratch_operands = 0 : i64, tpu.core_type = #tpu.core_type<tc>, window_params = [{transform_indices = @transform_0, window_bounds = array<i64: 8, 8>}, {transform_indices = @transform_1, window_bounds = array<i64: 8, 8, 16>}, {transform_indices = @transform_2, window_bounds = array<i64: 8, 16>}]} {
    %c0 = arith.constant 0 : index
    %c0_0 = arith.constant 0 : index
    %0 = vector.load %arg1[%c0, %c0_0] : memref<8x8xf32, #tpu.memory_space<vmem>>, vector<8x8xf32>
    %cst = arith.constant dense<0xFF800000> : vector<8xf32>
    %1 = vector.multi_reduction <maximumf>, %0, %cst [1] : vector<8x8xf32> to vector<8xf32>
    %2 = vector.shape_cast %1 : vector<8xf32> to vector<8x1xf32>
    %3 = vector.broadcast %2 : vector<8x1xf32> to vector<8x8xf32>
    %4 = arith.subf %0, %3 : vector<8x8xf32>
    %5 = math.exp %4 : vector<8x8xf32>
    %cst_1 = arith.constant dense<0.000000e+00> : vector<8xf32>
    %6 = vector.multi_reduction <add>, %5, %cst_1 [1] : vector<8x8xf32> to vector<8xf32>
    %7 = vector.shape_cast %6 : vector<8xf32> to vector<8x1xf32>
    %8 = vector.broadcast %7 : vector<8x1xf32> to vector<8x8xf32>
    %9 = arith.divf %5, %8 : vector<8x8xf32>
    %10 = vector.extract_strided_slice %9 {offsets = [0, 0], sizes = [8, 1], strides = [1, 1]} : vector<8x8xf32> to vector<8x1xf32>
    %c0_2 = arith.constant 0 : index
    %c0_3 = arith.constant 0 : index
    %c0_4 = arith.constant 0 : index
    %11 = vector.load %arg2[%c0_2, %c0_3, %c0_4] : memref<8x8x16xf32, #tpu.memory_space<vmem>>, vector<1x8x16xf32>
    %12 = vector.shape_cast %11 : vector<1x8x16xf32> to vector<8x16xf32>
    %13 = vector.broadcast %10 : vector<8x1xf32> to vector<8x16xf32>
    %14 = arith.mulf %13, %12 : vector<8x16xf32>
    %15 = vector.extract_strided_slice %9 {offsets = [0, 1], sizes = [8, 1], strides = [1, 1]} : vector<8x8xf32> to vector<8x1xf32>
    %c1 = arith.constant 1 : index
    %c0_5 = arith.constant 0 : index
    %c0_6 = arith.constant 0 : index
    %16 = vector.load %arg2[%c1, %c0_5, %c0_6] : memref<8x8x16xf32, #tpu.memory_space<vmem>>, vector<1x8x16xf32>
    %17 = vector.shape_cast %16 : vector<1x8x16xf32> to vector<8x16xf32>
    %18 = vector.broadcast %15 : vector<8x1xf32> to vector<8x16xf32>
    %19 = arith.mulf %18, %17 : vector<8x16xf32>
    %20 = arith.addf %14, %19 : vector<8x16xf32>
    %21 = vector.extract_strided_slice %9 {offsets = [0, 2], sizes = [8, 1], strides = [1, 1]} : vector<8x8xf32> to vector<8x1xf32>
    %c2 = arith.constant 2 : index
    %c0_7 = arith.constant 0 : index
    %c0_8 = arith.constant 0 : index
    %22 = vector.load %arg2[%c2, %c0_7, %c0_8] : memref<8x8x16xf32, #tpu.memory_space<vmem>>, vector<1x8x16xf32>
    %23 = vector.shape_cast %22 : vector<1x8x16xf32> to vector<8x16xf32>
    %24 = vector.broadcast %21 : vector<8x1xf32> to vector<8x16xf32>
    %25 = arith.mulf %24, %23 : vector<8x16xf32>
    %26 = arith.addf %20, %25 : vector<8x16xf32>
    %27 = vector.extract_strided_slice %9 {offsets = [0, 3], sizes = [8, 1], strides = [1, 1]} : vector<8x8xf32> to vector<8x1xf32>
    %c3 = arith.constant 3 : index
    %c0_9 = arith.constant 0 : index
    %c0_10 = arith.constant 0 : index
    %28 = vector.load %arg2[%c3, %c0_9, %c0_10] : memref<8x8x16xf32, #tpu.memory_space<vmem>>, vector<1x8x16xf32>
    %29 = vector.shape_cast %28 : vector<1x8x16xf32> to vector<8x16xf32>
    %30 = vector.broadcast %27 : vector<8x1xf32> to vector<8x16xf32>
    %31 = arith.mulf %30, %29 : vector<8x16xf32>
    %32 = arith.addf %26, %31 : vector<8x16xf32>
    %33 = vector.extract_strided_slice %9 {offsets = [0, 4], sizes = [8, 1], strides = [1, 1]} : vector<8x8xf32> to vector<8x1xf32>
    %c4 = arith.constant 4 : index
    %c0_11 = arith.constant 0 : index
    %c0_12 = arith.constant 0 : index
    %34 = vector.load %arg2[%c4, %c0_11, %c0_12] : memref<8x8x16xf32, #tpu.memory_space<vmem>>, vector<1x8x16xf32>
    %35 = vector.shape_cast %34 : vector<1x8x16xf32> to vector<8x16xf32>
    %36 = vector.broadcast %33 : vector<8x1xf32> to vector<8x16xf32>
    %37 = arith.mulf %36, %35 : vector<8x16xf32>
    %38 = arith.addf %32, %37 : vector<8x16xf32>
    %39 = vector.extract_strided_slice %9 {offsets = [0, 5], sizes = [8, 1], strides = [1, 1]} : vector<8x8xf32> to vector<8x1xf32>
    %c5 = arith.constant 5 : index
    %c0_13 = arith.constant 0 : index
    %c0_14 = arith.constant 0 : index
    %40 = vector.load %arg2[%c5, %c0_13, %c0_14] : memref<8x8x16xf32, #tpu.memory_space<vmem>>, vector<1x8x16xf32>
    %41 = vector.shape_cast %40 : vector<1x8x16xf32> to vector<8x16xf32>
    %42 = vector.broadcast %39 : vector<8x1xf32> to vector<8x16xf32>
    %43 = arith.mulf %42, %41 : vector<8x16xf32>
    %44 = arith.addf %38, %43 : vector<8x16xf32>
    %45 = vector.extract_strided_slice %9 {offsets = [0, 6], sizes = [8, 1], strides = [1, 1]} : vector<8x8xf32> to vector<8x1xf32>
    %c6 = arith.constant 6 : index
    %c0_15 = arith.constant 0 : index
    %c0_16 = arith.constant 0 : index
    %46 = vector.load %arg2[%c6, %c0_15, %c0_16] : memref<8x8x16xf32, #tpu.memory_space<vmem>>, vector<1x8x16xf32>
    %47 = vector.shape_cast %46 : vector<1x8x16xf32> to vector<8x16xf32>
    %48 = vector.broadcast %45 : vector<8x1xf32> to vector<8x16xf32>
    %49 = arith.mulf %48, %47 : vector<8x16xf32>
    %50 = arith.addf %44, %49 : vector<8x16xf32>
    %51 = vector.extract_strided_slice %9 {offsets = [0, 7], sizes = [8, 1], strides = [1, 1]} : vector<8x8xf32> to vector<8x1xf32>
    %c7 = arith.constant 7 : index
    %c0_17 = arith.constant 0 : index
    %c0_18 = arith.constant 0 : index
    %52 = vector.load %arg2[%c7, %c0_17, %c0_18] : memref<8x8x16xf32, #tpu.memory_space<vmem>>, vector<1x8x16xf32>
    %53 = vector.shape_cast %52 : vector<1x8x16xf32> to vector<8x16xf32>
    %54 = vector.broadcast %51 : vector<8x1xf32> to vector<8x16xf32>
    %55 = arith.mulf %54, %53 : vector<8x16xf32>
    %56 = arith.addf %50, %55 : vector<8x16xf32>
    %c0_19 = arith.constant 0 : index
    %c0_20 = arith.constant 0 : index
    %57 = vector.load %arg3[%c0_19, %c0_20] : memref<8x16xf32, #tpu.memory_space<vmem>>, vector<8x16xf32>
    tpu.vector_store %arg3[%c0_19, %c0_20], %56 {strides = array<i32>} : memref<8x16xf32, #tpu.memory_space<vmem>>, vector<8x16xf32>,
    return
  }
  func.func @transform_0(%arg0: i32) -> (i32, i32) {
    %c0_i32 = arith.constant 0 : i32
    %c0_i32_0 = arith.constant 0 : i32
    return %arg0, %c0_i32 : i32, i32
  }
  func.func @transform_1(%arg0: i32) -> (i32, i32, i32) {
    %c0_i32 = arith.constant 0 : i32
    %c0_i32_0 = arith.constant 0 : i32
    %c0_i32_1 = arith.constant 0 : i32
    return %c0_i32, %arg0, %c0_i32_0 : i32, i32, i32
  }
  func.func @transform_2(%arg0: i32) -> (i32, i32) {
    %c0_i32 = arith.constant 0 : i32
    %c0_i32_0 = arith.constant 0 : i32
    return %arg0, %c0_i32 : i32, i32
  }
}

</mosaic_0001>

<bundles_post_ra>
// kernel: tpu_custom_call.1
= control target key start
LH: loop header
LB: loop body
LE: loop exit
PB: predicated region body
PF: predicated region fallthrough
CT: control target
= control target key end

     0   :  { %7 = vsyncpa [#allocation3], 0  ;;  %s301_s0 = inlined_call_operand.hbm [shape: f32[8,8], index: 0, kind: input, shape index: {}]   ;;  %s302_s1 = inlined_call_operand.hbm [shape: f32[8,8,16], index: 1, kind: input, shape index: {}]   ;;  %s303_s2 = inlined_call_operand.hbm [shape: f32[8,16], index: 2, kind: output, shape index: {}]  }
   0x1   :  { %8 = vsyncpa [#allocation6], 0 }
   0x2   :  { %9 = vsyncpa [#allocation4], 0  ;;  %s230_s9 = smov [#allocation2]   ;;  %s231_s11 = smov [#allocation5]  }
   0x3   :  { %s16_s10 = sshll.u32 %s230_s9, 4  ;;  %s25_s12 = sshll.u32 %s231_s11, 4  ;;  %s17_s10 = int_to_ptr.vmem [resolvable:$true] %s16_s10  ;;  %s258_s12 = int_to_ptr.vmem [resolvable:$true] %s25_s12 }
   0x4   :  { %s158_s15 = scalar_lea.hbm %s301_s0, 128 }
   0x5   :  { %p159_p0 = scmp.ne.s32.totalorder %s301_s0, %s158_s15  ;;  %p162_p1 = scmp.lt.u32.totalorder %s158_s15, %s301_s0 }
   0x7   :  { %p164_p2 = pnand %p162_p1, %p159_p0 }
   0x9   :  { %167 = shalt.err (!%p164_p2)
}
   0xa   :  { %s168_s20 = scalar_lea.vmem %s17_s10, 128  ;;  %p173_p4 = scmp.lt.s32.totalorder %s17_s10, %s17_s10 }
   0xb   :  { %p169_p3 = scmp.ne.s32.totalorder %s17_s10, %s168_s20  ;;  %p174_p5 = scmp.lt.s32.totalorder %s168_s20, %s168_s20 }
   0xd   :  { %p175_p6 = por %p174_p5, %p173_p4 }
   0xf   :  { %p176_p7 = pnand %p175_p6, %p169_p3 }
  0x11   :  { %179 = shalt.err (!%p176_p7)
}
  0x12   :  { %19 = dma.hbm_to_vmem [thread:$0]  %s301_s0, 128, %s17_s10, [#allocation3]  }
  0x13   :  { %s180_s25 = scalar_lea.hbm %s302_s1, 1024 }
  0x14   :  { %p181_p8 = scmp.ne.s32.totalorder %s302_s1, %s180_s25  ;;  %p184_p9 = scmp.lt.u32.totalorder %s180_s25, %s302_s1 }
  0x16   :  { %p186_p10 = pnand %p184_p9, %p181_p8 }
  0x18   :  { %189 = shalt.err (!%p186_p10)
}
  0x19   :  { %s190_s30 = scalar_lea.vmem %s258_s12, 1024  ;;  %p195_p12 = scmp.lt.s32.totalorder %s258_s12, %s258_s12 }
  0x1a   :  { %p191_p11 = scmp.ne.s32.totalorder %s258_s12, %s190_s30  ;;  %p196_p13 = scmp.lt.s32.totalorder %s190_s30, %s190_s30 }
  0x1c   :  { %p197_p0 = por %p196_p13, %p195_p12 }
  0x1e   :  { %p198_p1 = pnand %p197_p0, %p191_p11 }
  0x20   :  { %201 = shalt.err (!%p198_p1)
}
  0x21   :  { %s232_s0 = smov 128   ;;  %s233_s3 = smov 8  }
  0x22   :  { %31 = dma.hbm_to_vmem [thread:$0]  %s302_s1, 1024, %s258_s12, [#allocation6], %s232_s0, %s232_s0, %s233_s3  }
  0x23   :  { %224 = dma.done.wait [#allocation3], 128  }
  0x24   :  { %225 = vsyncadd [#allocation3], 4294967168 }
  0x25   :  { %226 = dma.done.wait [#allocation6], 1024  }
  0x26   :  { %227 = vsyncadd [#allocation6], 4294966272  ;;  %vm39_vm0 = vcmask 64512   ;;  %v38_v0 = vld [vmem:[#allocation2] sm:$0xff]  ;;  %v234_v7 = vmov 2   ;;  %v235_v8 = vmov 0  }
  0x27   :  { %v40_v1 = vsel %vm39_vm0, %v38_v0, -inf  ;;  %147 = vset.pattern.permute.xlu0 %v234_v7  ;;  %145 = vset.pattern.permute.xlu1 %v235_v8  ;;  %v236_v12 = vmov 1   ;;  %v237_v13 = vmov 7   ;;  %v238_v14 = vmov 3   ;;  %v59_v20 = vld [vmem:[#allocation5 + $0x8] sm:$0xff]  ;;  %v51_v22 = vld [vmem:[#allocation5] sm:$0xff] }
  0x28   :  { %41 = vmax.xlane.f32.xlu0 %v40_v1  ;;  %v239_v15 = vmov 4   ;;  %v240_v16 = vmov 5   ;;  %v241_v17 = vmov 6   ;;  %v67_v26 = vld [vmem:[#allocation5 + $0x10] sm:$0xff]  ;;  %v75_v29 = vld [vmem:[#allocation5 + $0x18] sm:$0xff]  ;;  %v83_v31 = vld [vmem:[#allocation5 + $0x20] sm:$0xff] }
  0x29   :  { %v91_v35 = vld [vmem:[#allocation5 + $0x28] sm:$0xff]  ;;  %v99_v37 = vld [vmem:[#allocation5 + $0x30] sm:$0xff]  ;;  %v107_v43 = vld [vmem:[#allocation5 + $0x38] sm:$0xff]  ;;  %s242_s1 = smov [#allocation7]   ;;  %vm114_vm1 = vcmask 130048  }
  0x2a   :  { %s122_s6 = sshll.u32 %s242_s1, 4  ;;  %s123_s6 = int_to_ptr.vmem [resolvable:$true] %s122_s6 }
  0x2b   :  { %s202_s7 = scalar_lea.vmem %s123_s6, 128  ;;  %p207_p3 = scmp.lt.s32.totalorder %s123_s6, %s123_s6 }
  0x2c   :  { %p203_p2 = scmp.ne.s32.totalorder %s123_s6, %s202_s7  ;;  %p208_p4 = scmp.lt.s32.totalorder %s202_s7, %s202_s7 }
  0x2e   :  { %p209_p5 = por %p208_p4, %p207_p3 }
  0x30   :  { %p210_p6 = pnand %p209_p5, %p203_p2 }
  0xb5   :  { %v42_v2 = vpop.xlane.xlu0 %41 }
  0xb6   :  { %v43_v3 = vsub.f32 %v38_v0, %v42_v2 }
  0xb8   :  { %v44_v4 = vmul.f32 1.442695, %v43_v3 }
  0xba   :  { %154 = vpow2.f32 %v44_v4 }
  0xc4   :  { %v155_v5 = vpop.eup %154 }
  0xc5   :  { %v46_v6 = vsel %vm39_vm0, %v155_v5, 0.0 }
  0xc6   :  { %47 = vadd.xlane.f32.xlu0 %v46_v6 }
 0x153   :  { %v48_v9 = vpop.xlane.xlu0 %47 }
 0x154   :  { %156 = vrcp.f32 %v48_v9 }
 0x15e   :  { %v157_v10 = vpop.eup %156 }
 0x15f   :  { %v50_v11 = vmul.f32 %v157_v10, %v155_v5 }
 0x161   :  { %69 = vperm.xlu0 %147, %v50_v11   ;;  %54 = vperm.xlu1 %145, %v50_v11  }
 0x165   :  { %146 = vset.pattern.permute.xlu1 %v236_v12  ;;  %153 = vset.pattern.permute.xlu0 %v237_v13 }
 0x166   :  { %61 = vperm.xlu1 %146, %v50_v11  }
 0x16a   :  { %148 = vset.pattern.permute.xlu1 %v238_v14 }
 0x16b   :  { %77 = vperm.xlu1 %148, %v50_v11  }
 0x16f   :  { %149 = vset.pattern.permute.xlu1 %v239_v15 }
 0x170   :  { %85 = vperm.xlu1 %149, %v50_v11  }
 0x174   :  { %150 = vset.pattern.permute.xlu1 %v240_v16 }
 0x175   :  { %93 = vperm.xlu1 %150, %v50_v11  }
 0x179   :  { %151 = vset.pattern.permute.xlu1 %v241_v17 }
 0x17a   :  { %101 = vperm.xlu1 %151, %v50_v11  }
 0x17e   :  { %152 = vset.pattern.permute.xlu1 %v237_v13 }
 0x17f   :  { %109 = vperm.xlu1 %152, %v50_v11  }
 0x1e0   :  { %v55_v18 = vpop.permute.xlu1 %54  ;;  %v70_v27 = vpop.permute.xlu0 %69 }
 0x1e1   :  { %v57_v24 = vmul.f32 %v55_v18, %v51_v22  ;;  %v72_v30 = vmul.f32 %v70_v27, %v67_v26 }
 0x1e5   :  { %v62_v19 = vpop.permute.xlu1 %61 }
 0x1e6   :  { %v64_v23 = vmul.f32 %v62_v19, %v59_v20 }
 0x1e8   :  { %v65_v28 = vadd.f32 %v64_v23, %v57_v24 }
 0x1ea   :  { %v78_v21 = vpop.permute.xlu1 %77  ;;  %v73_v33 = vadd.f32 %v72_v30, %v65_v28 }
 0x1eb   :  { %v80_v34 = vmul.f32 %v78_v21, %v75_v29 }
 0x1ed   :  { %v81_v38 = vadd.f32 %v80_v34, %v73_v33 }
 0x1ef   :  { %v86_v25 = vpop.permute.xlu1 %85 }
 0x1f0   :  { %v88_v36 = vmul.f32 %v86_v25, %v83_v31 }
 0x1f2   :  { %v89_v41 = vadd.f32 %v88_v36, %v81_v38 }
 0x1f4   :  { %v94_v32 = vpop.permute.xlu1 %93 }
 0x1f5   :  { %v96_v39 = vmul.f32 %v94_v32, %v91_v35 }
 0x1f7   :  { %v97_v44 = vadd.f32 %v96_v39, %v89_v41 }
 0x1f9   :  { %v102_v40 = vpop.permute.xlu1 %101 }
 0x1fa   :  { %v104_v42 = vmul.f32 %v102_v40, %v99_v37 }
 0x1fc   :  { %v105_v46 = vadd.f32 %v104_v42, %v97_v44 }
 0x1fe   :  { %v110_v45 = vpop.permute.xlu1 %109 }
 0x1ff   :  { %v112_v47 = vmul.f32 %v110_v45, %v107_v43 }
 0x201   :  { %v113_v48 = vadd.f32 %v112_v47, %v105_v46 }
 0x203   :  { %115 = vst.msk [vmem:[#allocation7] sm:$0xff] %vm114_vm1, %v113_v48 }
 0x204   :  { %213 = shalt.err (!%p210_p6)
}
 0x205   :  { %s214_s10 = scalar_lea.hbm %s303_s2, 128 }
 0x206   :  { %p215_p7 = scmp.ne.s32.totalorder %s303_s2, %s214_s10  ;;  %p218_p8 = scmp.lt.u32.totalorder %s214_s10, %s303_s2 }
 0x208   :  { %p220_p9 = pnand %p218_p8, %p215_p7 }
 0x20a   :  { %223 = shalt.err (!%p220_p9)
}
 0x20b   :  { %125 = dma.vmem_to_hbm [thread:$0]  %s123_s6, 128, %s303_s2, [#allocation4]  }
 0x20c   :  { %228 = dma.done.wait [#allocation4], 128  }
 0x20d   :  { %229 = vsyncadd [#allocation4], 4294967168 }
 0x20e   :  { %129 = vsyncpa [#allocation3], 1 }
 0x20f   :  { %130 = vsyncpa [#allocation6], 1 }
 0x210   :  { %131 = vsyncpa [#allocation4], 1 }

</bundles_post_ra>
